<compile_context>
chip_gen: v6e
topology: v6e:2x2x1
jax: 0.10.0
libtpu: 0.0.40
codegen_flags: <defaults>
</compile_context>

<pallas_src>
import functools
import math

import jax
import jax.numpy as jnp
from jax.experimental import pallas as pl
from jax.experimental.pallas import tpu as pltpu

LANES = 128
SUBLANES = 8
NUM_CORES = 2           # shards of the "parallel" outer grid axis (v7x has 2 TCs)
MAX_TILE_ROWS = 4096    # (4096, 128) f32 = 2 MiB per tile per input


def _slab_geometry(n_elems):
    """Pick tile_rows and padded total_rows for an n_elems-long flat stream."""
    rows = max(1, pl.cdiv(n_elems, LANES))
    rows = pl.cdiv(rows, SUBLANES) * SUBLANES             # sublane multiple
    tile_rows = min(MAX_TILE_ROWS, rows)                  # clamp tiny models
    block = NUM_CORES * tile_rows
    total_rows = pl.cdiv(rows, block) * block             # grid-divisible
    return tile_rows, total_rows


def _pack_to_slab(arrays, total_rows, dtype):
    """Flatten+concat -> zero-pad -> lane-dense (total_rows, 128) slab."""
    flat = jnp.concatenate([jnp.ravel(a).astype(jnp.float32) for a in arrays])
    flat = jnp.pad(flat, (0, total_rows * LANES - flat.shape[0]))
    return flat.reshape(total_rows, LANES).astype(dtype)


def _ewc_kernel(fisher_ref, old_ref, cur_ref, out_ref):
    """Resident (8,128) per-core accumulator += folded fisher * (old - cur)^2."""
    i = pl.program_id(1)

    @pl.when(i == 0)
    def _():
        out_ref[...] = jnp.zeros_like(out_ref)

    f = fisher_ref[...].astype(jnp.float32)               # bf16 fisher upcast is free-ish VPU
    diff = old_ref[...].astype(jnp.float32) - cur_ref[...].astype(jnp.float32)
    contrib = f * diff * diff                             # pure VPU
    tile_rows = contrib.shape[0]
    # Fold (tile_rows, 128) -> (8, 128): cross-vreg VPU adds, no XLU work.
    out_ref[...] += contrib.reshape(tile_rows // SUBLANES, SUBLANES, LANES).sum(axis=0)


def _ewc_sum_pallas(fisher_2d, old_2d, cur_2d, tile_rows):
    total_rows = fisher_2d.shape[0]
    inner = (total_rows // NUM_CORES) // tile_rows
    grid = (NUM_CORES, inner)

    def in_map(c, i):
        return (c * inner + i, 0)

    tile_spec = pl.BlockSpec((tile_rows, LANES), in_map)
    out_spec = pl.BlockSpec((SUBLANES, LANES), lambda c, i: (c, 0))

    n_elems = total_rows * LANES
    in_bytes = n_elems * (fisher_2d.dtype.itemsize
                          + old_2d.dtype.itemsize
                          + cur_2d.dtype.itemsize)

    partials = pl.pallas_call(
        _ewc_kernel,
        out_shape=jax.ShapeDtypeStruct((NUM_CORES * SUBLANES, LANES), jnp.float32),
        grid_spec=pltpu.PrefetchScalarGridSpec(
            num_scalar_prefetch=0,
            grid=grid,
            in_specs=[tile_spec, tile_spec, tile_spec],
            out_specs=out_spec,
        ),
        compiler_params=pltpu.CompilerParams(
            dimension_semantics=("parallel", "arbitrary"),
            vmem_limit_bytes=32 << 20,   # 12 MiB of double-buffered tiles + headroom
        ),
        cost_estimate=pl.CostEstimate(
            flops=5 * n_elems,           # sub, mul, mul, fold-add, acc-add
            transcendentals=0,
            bytes_accessed=in_bytes + NUM_CORES * SUBLANES * LANES * 4,
        ),
    )(fisher_2d, old_2d, cur_2d)

    return jnp.sum(partials)


# ---- custom VJP so the loss is differentiable (training regularizer) --------

@functools.partial(jax.custom_vjp, nondiff_argnums=(0,))
def _ewc_sum(tile_rows, fisher_2d, old_2d, cur_2d):
    return _ewc_sum_pallas(fisher_2d, old_2d, cur_2d, tile_rows)


def _ewc_sum_fwd(tile_rows, fisher_2d, old_2d, cur_2d):
    s = _ewc_sum_pallas(fisher_2d, old_2d, cur_2d, tile_rows)
    return s, (fisher_2d, old_2d, cur_2d)


def _ewc_sum_bwd(tile_rows, residuals, g):
    # Analytic gradient of s = sum(fisher * (old - cur)^2).  Plain fused XLA
    # elementwise is fine here (memory-bound; a second kernel buys nothing).
    fisher_2d, old_2d, cur_2d = residuals
    f = fisher_2d.astype(jnp.float32)
    diff = old_2d.astype(jnp.float32) - cur_2d.astype(jnp.float32)
    d_fisher = (g * diff * diff).astype(fisher_2d.dtype)
    d_old = (2.0 * g * f * diff).astype(old_2d.dtype)
    d_cur = (-2.0 * g * f * diff).astype(cur_2d.dtype)
    return d_fisher, d_old, d_cur


_ewc_sum.defvjp(_ewc_sum_fwd, _ewc_sum_bwd)


# ---- public API --------------------------------------------------------------

def _included_names(params):
    # Matches the `if 'fc' in name: continue` filter in the PyTorch module.
    return [name for name in params if "fc" not in name]


def make_ewc_loss(frozen_params, fisher, lambda_ewc=10000.0,
                  fisher_dtype=jnp.float32):
    """Mirror of EWCLoss.__init__: packs the constant fisher / frozen slabs once.

    fisher_dtype=jnp.bfloat16 halves the fisher HBM traffic (fisher is a
    regularizer weight, so bf16 is generally safe); default is f32 for exact
    parity with the PyTorch module.
    """
    names = _included_names(frozen_params)
    if not names:
        # Every parameter was filtered out: loss is identically zero.
        return lambda cur_params: jnp.float32(0.0)

    n_elems = sum(math.prod(frozen_params[name].shape) for name in names)
    tile_rows, total_rows = _slab_geometry(n_elems)

    fisher_2d = _pack_to_slab([fisher[name] for name in names], total_rows, fisher_dtype)
    old_2d = _pack_to_slab([frozen_params[name] for name in names], total_rows, jnp.float32)
    lam = jnp.float32(lambda_ewc)

    @jax.jit
    def _loss(fisher_2d, old_2d, lam, cur_leaves):
        # Pack + pallas_call + scale all under one jit: the cur pack is a single
        # fused copy, and the constant slabs are arguments, not baked constants.
        cur_2d = _pack_to_slab(cur_leaves, total_rows, jnp.float32)
        return 0.5 * lam * _ewc_sum(tile_rows, fisher_2d, old_2d, cur_2d)

    def loss_fn(cur_params):
        # TODO(synk): for the ideal 3-passes-over-N HBM traffic, keep the
        # optimizer's copy of these parameters in the packed (rows, 128) slab
        # layout and feed it straight to _ewc_sum instead of re-packing per call.
        cur_leaves = [cur_params[name] for name in names]
        return _loss(fisher_2d, old_2d, lam, cur_leaves)

    return loss_fn


def ewc_loss(cur_params, frozen_params, fisher, lambda_ewc=10000.0):
    """One-shot convenience wrapper (equivalent to EWCLoss(...)(cur_model))."""
    return make_ewc_loss(frozen_params, fisher, lambda_ewc)(cur_params)


def _reference(cur_params, frozen_params, fisher, lambda_ewc=10000.0):
    loss_reg = 0.0
    for name in cur_params:
        if "fc" in name:
            continue
        diff = frozen_params[name].astype(jnp.float32) - cur_params[name].astype(jnp.float32)
        loss_reg += jnp.sum(fisher[name].astype(jnp.float32) * diff * diff) / 2.0
    return lambda_ewc * loss_reg


if __name__ == "__main__":
    key = jax.random.PRNGKey(0)

    # Small synthetic model: two conv layers (OIHW weights) plus an 'fc' layer
    # that must be skipped by the EWC loss.
    param_shapes = {
        "conv1.weight": (4, 4, 3, 3),
        "conv1.bias": (4,),
        "conv2.weight": (4, 4, 3, 3),
        "conv2.bias": (4,),
        "fc.weight": (10, 4 * 16 * 16),  # skipped ('fc' in name)
        "fc.bias": (10,),                # skipped ('fc' in name)
    }

    cur_params, frozen_params, fisher = {}, {}, {}
    for name, shape in param_shapes.items():
        key, k1, k2, k3 = jax.random.split(key, 4)
        cur_params[name] = jax.random.normal(k1, shape, dtype=jnp.float32)
        frozen_params[name] = jax.random.normal(k2, shape, dtype=jnp.float32)
        fisher[name] = jax.random.uniform(k3, shape, dtype=jnp.float32)  # non-negative

    lam = 10000.0

    # 1) f32 constants: exact parity with the PyTorch module.
    loss_fn = make_ewc_loss(frozen_params, fisher, lambda_ewc=lam)
    loss = jax.block_until_ready(loss_fn(cur_params))
    ref = jax.block_until_ready(_reference(cur_params, frozen_params, fisher, lam))
    assert jnp.allclose(loss, ref, rtol=1e-5, atol=1e-2), (loss, ref)

    # 2) bf16 fisher constants (lower HBM traffic); check against a reference
    #    that uses the same bf16-rounded fisher, so the comparison stays tight.
    loss_fn_bf16 = make_ewc_loss(frozen_params, fisher, lambda_ewc=lam,
                                 fisher_dtype=jnp.bfloat16)
    fisher_bf16 = {k: v.astype(jnp.bfloat16).astype(jnp.float32) for k, v in fisher.items()}
    loss_b = jax.block_until_ready(loss_fn_bf16(cur_params))
    ref_b = jax.block_until_ready(_reference(cur_params, frozen_params, fisher_bf16, lam))
    assert jnp.allclose(loss_b, ref_b, rtol=1e-5, atol=1e-2), (loss_b, ref_b)

    # 3) Training path: gradient via custom_vjp vs. plain-JAX autodiff reference.
    g_kernel = jax.block_until_ready(jax.grad(loss_fn)(cur_params))
    g_ref = jax.block_until_ready(
        jax.grad(lambda p: _reference(p, frozen_params, fisher, lam))(cur_params))
    for name in cur_params:
        assert jnp.allclose(g_kernel[name], g_ref[name], rtol=1e-4, atol=1e-2), name

    print("KERNEL_OK")
</pallas_src>

<mosaic_0001>
module attributes {stable_mosaic.version = 11 : i64} {
  func.func @_ewc_kernel(%arg0: i32, %arg1: i32, %arg2: memref<8x128xf32, #tpu.memory_space<vmem>>, %arg3: memref<8x128xf32, #tpu.memory_space<vmem>>, %arg4: memref<8x128xf32, #tpu.memory_space<vmem>>, %arg5: memref<8x128xf32, #tpu.memory_space<vmem>>) attributes {dimension_semantics = [#tpu.dimension_semantics<parallel>, #tpu.dimension_semantics<arbitrary>], iteration_bounds = array<i64: 2, 1>, scalar_prefetch = 0 : i64, scratch_operands = 0 : i64, tpu.core_type = #tpu.core_type<tc>, window_params = [{transform_indices = @transform_0, window_bounds = array<i64: 8, 128>}, {transform_indices = @transform_1, window_bounds = array<i64: 8, 128>}, {transform_indices = @transform_2, window_bounds = array<i64: 8, 128>}, {transform_indices = @transform_3, window_bounds = array<i64: 8, 128>}]} {
    %c0_i32 = arith.constant 0 : i32
    %0 = arith.cmpi eq, %arg1, %c0_i32 : i32
    %1 = arith.extui %0 : i1 to i32
    %c0_i32_0 = arith.constant 0 : i32
    %2 = arith.cmpi ne, %1, %c0_i32_0 : i32
    scf.if %2 {
      %cst_10 = arith.constant 0.000000e+00 : f32
      %14 = vector.broadcast %cst_10 : f32 to vector<8x128xf32>
      %c0_11 = arith.constant 0 : index
      %c0_12 = arith.constant 0 : index
      %15 = vector.load %arg5[%c0_11, %c0_12] : memref<8x128xf32, #tpu.memory_space<vmem>>, vector<8x128xf32>
      tpu.vector_store %arg5[%c0_11, %c0_12], %14 {strides = array<i32>} : memref<8x128xf32, #tpu.memory_space<vmem>>, vector<8x128xf32>,
    } else {
    }
    %c0 = arith.constant 0 : index
    %c0_1 = arith.constant 0 : index
    %3 = vector.load %arg2[%c0, %c0_1] : memref<8x128xf32, #tpu.memory_space<vmem>>, vector<8x128xf32>
    %c0_2 = arith.constant 0 : index
    %c0_3 = arith.constant 0 : index
    %4 = vector.load %arg3[%c0_2, %c0_3] : memref<8x128xf32, #tpu.memory_space<vmem>>, vector<8x128xf32>
    %c0_4 = arith.constant 0 : index
    %c0_5 = arith.constant 0 : index
    %5 = vector.load %arg4[%c0_4, %c0_5] : memref<8x128xf32, #tpu.memory_space<vmem>>, vector<8x128xf32>
    %6 = arith.subf %4, %5 : vector<8x128xf32>
    %7 = arith.mulf %3, %6 : vector<8x128xf32>
    %8 = arith.mulf %7, %6 : vector<8x128xf32>
    %c0_6 = arith.constant 0 : index
    %c0_7 = arith.constant 0 : index
    %9 = vector.load %arg5[%c0_6, %c0_7] : memref<8x128xf32, #tpu.memory_space<vmem>>, vector<8x128xf32>
    %10 = vector.shape_cast %8 : vector<8x128xf32> to vector<1x8x128xf32>
    %cst = arith.constant dense<0.000000e+00> : vector<8x128xf32>
    %11 = vector.multi_reduction <add>, %10, %cst [0] : vector<1x8x128xf32> to vector<8x128xf32>
    %12 = arith.addf %9, %11 : vector<8x128xf32>
    %c0_8 = arith.constant 0 : index
    %c0_9 = arith.constant 0 : index
    %13 = vector.load %arg5[%c0_8, %c0_9] : memref<8x128xf32, #tpu.memory_space<vmem>>, vector<8x128xf32>
    tpu.vector_store %arg5[%c0_8, %c0_9], %12 {strides = array<i32>} : memref<8x128xf32, #tpu.memory_space<vmem>>, vector<8x128xf32>,
    return
  }
  func.func @transform_0(%arg0: i32, %arg1: i32) -> (i32, i32) {
    %c1_i32 = arith.constant 1 : i32
    %0 = arith.muli %arg0, %c1_i32 : i32
    %1 = arith.addi %0, %arg1 : i32
    %c0_i32 = arith.constant 0 : i32
    %c0_i32_0 = arith.constant 0 : i32
    return %1, %c0_i32 : i32, i32
  }
  func.func @transform_1(%arg0: i32, %arg1: i32) -> (i32, i32) {
    %c1_i32 = arith.constant 1 : i32
    %0 = arith.muli %arg0, %c1_i32 : i32
    %1 = arith.addi %0, %arg1 : i32
    %c0_i32 = arith.constant 0 : i32
    %c0_i32_0 = arith.constant 0 : i32
    return %1, %c0_i32 : i32, i32
  }
  func.func @transform_2(%arg0: i32, %arg1: i32) -> (i32, i32) {
    %c1_i32 = arith.constant 1 : i32
    %0 = arith.muli %arg0, %c1_i32 : i32
    %1 = arith.addi %0, %arg1 : i32
    %c0_i32 = arith.constant 0 : i32
    %c0_i32_0 = arith.constant 0 : i32
    return %1, %c0_i32 : i32, i32
  }
  func.func @transform_3(%arg0: i32, %arg1: i32) -> (i32, i32) {
    %c0_i32 = arith.constant 0 : i32
    %c0_i32_0 = arith.constant 0 : i32
    return %arg0, %c0_i32 : i32, i32
  }
}

</mosaic_0001>

<bundles_post_ra>
// kernel: _loss.1
= control target key start
LH: loop header
LB: loop body
LE: loop exit
PB: predicated region body
PF: predicated region fallthrough
CT: control target
= control target key end

     0   :  { %s413_s12 = smov 0   ;;  %s415_s13 = smov 0   ;;  %s440_s0 = inlined_call_operand.vmem [shape: f32[16,128], index: 0, kind: input, shape index: {}]   ;;  %s441_s1 = inlined_call_operand.vmem [shape: f32[16,128], index: 1, kind: input, shape index: {}]   ;;  %s442_s2 = inlined_call_operand.vmem [shape: f32[16,128], index: 2, kind: input, shape index: {}]   ;;  %s443_s3 = inlined_call_operand.vmem [shape: f32[16,128], index: 3, kind: output, shape index: {}]  }
   0x1   :  { %s417_s14 = smov 0  }
   0x2 LB: > { %s25_s15 = sadd.s32 1, %s387_s13  ;;  %p337_p0 = scmp.ge.s32.totalorder %s391_s14, 1  ;;  %s391_s14 = sphi %s417_s14, %s13_s14   ;;  %s387_s13 = sphi %s415_s13, %s445_s13   ;;  %s383_s12 = sphi %s413_s12, %s444_s12  }
   0x3   : > { %p27_p1 = scmp.ge.s32.totalorder %s25_s15, 2  ;;  %p178_p2 = scmp.lt.s32.totalorder %s391_s14, 3 }
   0x5   : > { %s447_s15 = smov (%p27_p1, %s25_s15), 0  ;;  %p179_p3 = pnand %p337_p0, %p178_p2 }
   0x6   : > { %p212_p4 = scmp.lt.s32.totalorder (!%p179_p3), %s383_s12, 1 }
   0x7   : > { %182 = sbr.rel (%p179_p3) target bundleno = 25 (0x19), region = 32 }
   0xc   : > { %s449_s12 = smov (!%p212_p4, %s383_s12), 1 }
   0xd   : > { %s338_s16 = sshll.u32 %s449_s12, 3 }
   0xe   : > { %s215_s19 = scalar_lea.vmem %s440_s0, %s338_s16  ;;  %s221_s22 = scalar_lea.vmem %s441_s1, %s338_s16 }
   0xf   : > { %s227_s25 = scalar_lea.vmem %s442_s2, %s338_s16  ;;  %v238_v0 = vld [vmem:[%s215_s19] sm:$0xff]  ;;  %s232_s28 = scalar_lea.vmem %s443_s3, %s338_s16 }
  0x10   : > { %v239_v1 = vld [vmem:[%s221_s22] sm:$0xff] }
  0x11   : > { %v240_v2 = vld [vmem:[%s227_s25] sm:$0xff] }
  0x12   : > { %v241_v3 = vsub.f32 %v239_v1, %v240_v2 }
  0x14   : > { %v242_v4 = vmul.f32 %v241_v3, %v238_v0 }
  0x16   : > { %v243_v5 = vmul.f32 %v242_v4, %v241_v3 }
  0x18   : > { %247 = vst [vmem:[%s232_s28] sm:$0xff] %v243_v5 }
  0x19 PF: > { %s13_s14 = sadd.s32 1, %s391_s14   ;;  %s444_s12 = smov %s387_s13 }
  0x1a   : > { %p10_p5 = scmp.ge.s32.totalorder %s13_s14, 4   ;;  %s445_s13 = smov %s447_s15 }
  0x1c   :  { %12 = sbr.rel (!%p10_p5) target bundleno = 2 (0x2), region = 72 }

</bundles_post_ra>
